<compile_context>
chip_gen: v6e
topology: v6e:2x2x1
jax: 0.10.0
libtpu: 0.0.40
codegen_flags: <defaults>
</compile_context>

<pallas_src>
import jax
import jax.numpy as jnp
from jax.experimental import pallas as pl
from jax.experimental.pallas import tpu as pltpu


# ----------------------------- z_space stand-ins -----------------------------
class Discrete:
    def __init__(self, n):
        self.n = n


class Box:
    def __init__(self, shape):
        self.shape = shape


# --------------------------------- helpers ------------------------------------
def _round_up(x, m):
    return ((x + m - 1) // m) * m


def _cdiv(a, b):
    return (a + b - 1) // b


def _target_block_bytes():
    # Per-generation output-block budget.  The pipeliner double-buffers, so
    # 2x this (+ tiny input blocks) must stay under the scoped-VMEM default
    # (16 MiB on v5e, 32 MiB on v6e/v7x) — all three choices do.
    try:
        kind = jax.devices()[0].device_kind.lower()
    except Exception:
        kind = ""
    if "v7" in kind:
        return 8 << 20   # ~3.2 TB/s HBM: big blocks amortize ~0.35us/step
    if "v5" in kind:
        return 4 << 20   # ~0.8 TB/s HBM: 4 MiB already <10% step overhead
    return 6 << 20       # v6e / unknown


# ------------------------------ Pallas kernel ---------------------------------
def _one_hot_kernel(x_ref, o_ref):
    # x_ref: (tile_r, 1) int32     o_ref: (tile_r, tile_n) out_dtype
    idx = x_ref[...]                                               # (tile_r, 1)
    tile_n = o_ref.shape[1]
    col0 = pl.program_id(1) * tile_n                               # class-tile offset
    classes = col0 + jax.lax.broadcasted_iota(jnp.int32, o_ref.shape, 1)
    # VPU compare + select is free filler under the HBM-store bottleneck.
    o_ref[...] = (idx == classes).astype(o_ref.dtype)


def one_hot_pallas(x, n, *, out_dtype=jnp.float32):
    """one_hot over a flattened index tensor: x (any int shape) -> (*x.shape, n).

    The HBM output is written un-padded along the class axis (the output
    block's last dim equals n), so no wrapper slice / extra HBM pass is
    needed.  Very large vocabularies fall back to 128-lane class tiling.
    """
    orig_shape = x.shape
    x_flat = x.reshape(-1).astype(jnp.int32)
    rows = x_flat.shape[0]
    itemsize = jnp.dtype(out_dtype).itemsize
    sub = {4: 8, 2: 16, 1: 32}.get(itemsize, 8)    # sublane alignment per dtype

    target = _target_block_bytes()

    # --- class tiling ---------------------------------------------------------
    if sub * n * itemsize > target:
        # Huge vocab: tile the class axis in lane-dense 128-multiples so a
        # single block never blows scoped VMEM.
        tile_n = max(128, (target // (sub * itemsize)) // 128 * 128)
        tile_r = sub
    else:
        tile_n = n                                  # full last dim -> legal block
        bytes_per_row = max(1, n * itemsize)
        tile_r = max(sub, (target // bytes_per_row) // sub * sub)

    # --- row tiling -----------------------------------------------------------
    rows_al = _round_up(max(rows, 1), sub)
    tile_r = min(tile_r, rows_al)
    # >=2 row steps whenever possible so "parallel" can shard across both
    # TensorCores (v7x megacore); one extra ~0.35us step is noise otherwise.
    if _cdiv(rows_al, tile_r) < 2 and rows_al >= 2 * sub:
        tile_r = _round_up(_cdiv(rows_al, 2), sub)
    rows_pad = _round_up(max(rows, 1), tile_r)

    if rows_pad != rows:
        # Pad with index 0 (< n); padded rows are dropped by the row slice below.
        x_flat = jnp.pad(x_flat, (0, rows_pad - rows))
    x2d = x_flat.reshape(rows_pad, 1)

    grid = (rows_pad // tile_r, _cdiv(n, tile_n))

    cost = pl.CostEstimate(
        flops=rows_pad * n,
        transcendentals=0,
        bytes_accessed=rows_pad * n * itemsize + rows_pad * 4,
    )

    out = pl.pallas_call(
        _one_hot_kernel,
        out_shape=jax.ShapeDtypeStruct((rows_pad, n), out_dtype),
        grid=grid,
        in_specs=[pl.BlockSpec((tile_r, 1), lambda r, j: (r, 0))],
        out_specs=pl.BlockSpec((tile_r, tile_n), lambda r, j: (r, j)),
        compiler_params=pltpu.CompilerParams(
            dimension_semantics=("parallel", "parallel"),
        ),
        cost_estimate=cost,
    )(x2d)

    if rows_pad != rows:
        out = out[:rows]
    return out.reshape(*orig_shape, n)


# ------------------------------ Module wrapper ---------------------------------
class ZTransform:
    """JAX/Pallas port of rpg.utils.ZTransform. No learnable parameters."""

    def __init__(self, z_space, validate=False, out_dtype=jnp.float32):
        self.z_space = z_space
        self.validate = validate            # debug-only host-side range check
        self.out_dtype = out_dtype          # bf16/int8 possible if consumer allows
        if isinstance(self.z_space, Discrete):
            self.output_dim = self.z_space.n
        else:
            self.output_dim = self.z_space.shape[-1]

    def __call__(self, x):
        if isinstance(self.z_space, Discrete):
            if self.validate:
                # Debug-only: forces a device->host sync; off by default.
                xmax = int(jnp.max(x))
                assert xmax < self.z_space.n, f"{xmax} < {self.z_space.n}"
            # TODO(synk): if the consumer is `one_hot(x) @ W`, fuse as a row
            # gather of W instead of materializing the (rows, n) slab.
            return one_hot_pallas(x, self.z_space.n, out_dtype=self.out_dtype)
        else:
            # Continuous z_space: torch forward is `return x` — no copy kernel.
            return x


# ----------------------------------- main --------------------------------------
if __name__ == "__main__":
    key = jax.random.PRNGKey(0)
    k1, k2, k3, k4 = jax.random.split(key, 4)

    # Discrete branch: batch=2, seq=8, n=32 classes (tiny; 2-step row grid).
    n_classes = 32
    x_disc = jax.random.randint(k1, (2, 8), 0, n_classes, dtype=jnp.int32)
    zt_disc = ZTransform(Discrete(n_classes))
    out_disc = jax.block_until_ready(zt_disc(x_disc))

    ref = jax.nn.one_hot(x_disc, n_classes, dtype=jnp.float32)
    assert out_disc.shape == (2, 8, n_classes)
    assert out_disc.dtype == jnp.float32
    assert jnp.allclose(out_disc, ref)

    # Discrete branch 2: non-128-multiple n and rows needing sublane/row padding
    # (exercises masked tail stores + multi-step row grid, no HBM re-slice).
    n_classes2 = 40
    x_disc2 = jax.random.randint(k3, (4, 300), 0, n_classes2, dtype=jnp.int32)
    zt_disc2 = ZTransform(Discrete(n_classes2))
    out_disc2 = jax.block_until_ready(zt_disc2(x_disc2))
    ref2 = jax.nn.one_hot(x_disc2, n_classes2, dtype=jnp.float32)
    assert out_disc2.shape == (4, 300, n_classes2)
    assert jnp.allclose(out_disc2, ref2)

    # Discrete branch 3: n multiple of 128 (fully unmasked lane-dense stores).
    n_classes3 = 256
    x_disc3 = jax.random.randint(k4, (3, 17), 0, n_classes3, dtype=jnp.int32)
    zt_disc3 = ZTransform(Discrete(n_classes3))
    out_disc3 = jax.block_until_ready(zt_disc3(x_disc3))
    ref3 = jax.nn.one_hot(x_disc3, n_classes3, dtype=jnp.float32)
    assert out_disc3.shape == (3, 17, n_classes3)
    assert jnp.allclose(out_disc3, ref3)

    # Continuous branch: identity pass-through (no kernel launched).
    x_cont = jax.random.normal(k2, (2, 8, 32), dtype=jnp.float32)
    zt_cont = ZTransform(Box(shape=(32,)))
    out_cont = jax.block_until_ready(zt_cont(x_cont))
    assert out_cont.shape == x_cont.shape
    assert jnp.allclose(out_cont, x_cont)

    print("KERNEL_OK")
</pallas_src>

<mosaic_0001>
module attributes {stable_mosaic.version = 11 : i64} {
  func.func @_one_hot_kernel(%arg0: i32, %arg1: i32, %arg2: memref<8x1xi32, #tpu.memory_space<vmem>>, %arg3: memref<8x32xf32, #tpu.memory_space<vmem>>) attributes {dimension_semantics = [#tpu.dimension_semantics<parallel>, #tpu.dimension_semantics<parallel>], iteration_bounds = array<i64: 2, 1>, scalar_prefetch = 0 : i64, scratch_operands = 0 : i64, tpu.core_type = #tpu.core_type<tc>, window_params = [{transform_indices = @transform_0, window_bounds = array<i64: 8, 1>}, {transform_indices = @transform_1, window_bounds = array<i64: 8, 32>}]} {
    %c0 = arith.constant 0 : index
    %c0_0 = arith.constant 0 : index
    %0 = vector.load %arg2[%c0, %c0_0] : memref<8x1xi32, #tpu.memory_space<vmem>>, vector<8x1xi32>
    %c32_i32 = arith.constant 32 : i32
    %1 = arith.muli %arg1, %c32_i32 : i32
    %2 = tpu.iota {dimensions = array<i32: 1>} : vector<8x32xi32>
    %3 = vector.broadcast %1 : i32 to vector<8x32xi32>
    %4 = arith.addi %3, %2 : vector<8x32xi32>
    %5 = vector.broadcast %0 : vector<8x1xi32> to vector<8x32xi32>
    %6 = arith.cmpi eq, %5, %4 : vector<8x32xi32>
    %7 = arith.extui %6 : vector<8x32xi1> to vector<8x32xi32>
    %8 = arith.sitofp %7 : vector<8x32xi32> to vector<8x32xf32>
    %c0_1 = arith.constant 0 : index
    %c0_2 = arith.constant 0 : index
    %9 = vector.load %arg3[%c0_1, %c0_2] : memref<8x32xf32, #tpu.memory_space<vmem>>, vector<8x32xf32>
    tpu.vector_store %arg3[%c0_1, %c0_2], %8 {strides = array<i32>} : memref<8x32xf32, #tpu.memory_space<vmem>>, vector<8x32xf32>,
    return
  }
  func.func @transform_0(%arg0: i32, %arg1: i32) -> (i32, i32) {
    %c0_i32 = arith.constant 0 : i32
    %c0_i32_0 = arith.constant 0 : i32
    return %arg0, %c0_i32 : i32, i32
  }
  func.func @transform_1(%arg0: i32, %arg1: i32) -> (i32, i32) {
    %c0_i32 = arith.constant 0 : i32
    return %arg0, %arg1 : i32, i32
  }
}

</mosaic_0001>

<bundles_post_ra>
// kernel: tpu_custom_call.1
= control target key start
LH: loop header
LB: loop body
LE: loop exit
PB: predicated region body
PF: predicated region fallthrough
CT: control target
= control target key end

     0   :  { %6 = vsyncpa [#allocation3], 0  ;;  %s495_s0 = inlined_call_operand.vmem [shape: s32[16,1], index: 0, kind: input, shape index: {}]   ;;  %s496_s1 = inlined_call_operand.hbm [shape: f32[16,32], index: 1, kind: output, shape index: {}]  }
   0x1   :  { %8 = vsyncpa [#allocation3 + $0x1], 0  ;;  %s384_s6 = smov 0   ;;  %s386_s7 = smov 0  }
   0x2   :  { %s388_s8 = smov 0   ;;  %s390_s9 = smov 0  }
   0x3   :  { %s392_s10 = smov 0   ;;  %s394_s11 = smov 0  }
   0x4 LB: > { %s223_s12 = sadd.s32 4294967295, %s369_s11   ;;  %s224_s13 = sadd.s32 4294967294, %s369_s11   ;;  %s369_s11 = sphi %s394_s11, %s14_s11   ;;  %s365_s10 = sphi %s392_s10, %s503_s10   ;;  %s361_s9 = sphi %s390_s9, %s502_s9   ;;  %s357_s8 = sphi %s388_s8, %s501_s8   ;;  %s353_s7 = sphi %s386_s7, %s500_s7   ;;  %s349_s6 = sphi %s384_s6, %s499_s6  }
   0x5   : > { %s26_s14 = sadd.s32 1, %s365_s10  ;;  %s61_s15 = sadd.s32 1, %s357_s8 }
   0x6   : > { %p28_p0 = scmp.ge.s32.totalorder %s26_s14, 2  ;;  %p71_p1 = scmp.ne.s32.totalorder %s357_s8, %s353_s7 }
   0x7   : > { %p72_p2 = scmp.eq.s32.totalorder %s223_s12, 1  ;;  %p77_p3 = scmp.ne.s32.totalorder %s353_s7, %s349_s6 }
   0x8   : > { %s505_s14 = smov (%p28_p0, %s26_s14), 0  ;;  %p78_p5 = scmp.eq.s32.totalorder %s224_s13, 1 }
   0x9   : > { %p424_p4 = por %p72_p2, %p71_p1  ;;  %s56_s17 = ssub.s32 %s365_s10, %s505_s14 }
   0xa   : > { %p227_p6 = scmp.ge.s32.totalorder %s369_s11, 1  ;;  %p59_p7 = scmp.eq.s32.totalorder %s56_s17, 0 }
   0xb   : > { %p431_p8 = por %p78_p5, %p77_p3  ;;  %p103_p9 = scmp.lt.s32.totalorder %s369_s11, 3 }
   0xc   : > { %s437_s19 = scalar_select %p59_p7, %s357_s8, %s61_s15  }
   0xd   : > { %p104_p10 = pnand %p227_p6, %p103_p9 }
   0xe   : > { %p122_p11 = scmp.lt.s32.totalorder (!%p104_p10), %s361_s9, 1  ;;  %s119_s25 = sand.u32 (!%p104_p10), 1, %s353_s7  }
   0xf   : > { %107 = sbr.rel (%p104_p10) target bundleno = 164 (0xa4), region = 24  ;;  %s228_s26 = sshll.u32 (!%p104_p10), %s119_s25, 3 }
  0x10   : > { %s232_s27 = sshll.u32 (!%p104_p10), %s361_s9, 7  ;;  %s121_s28 = scalar_lea.vmem (!%p104_p10), [#allocation2], %s228_s26 }
  0x11   : > { %s155_s29 = sshll.u32 (!%p104_p10), %s121_s28, 4  ;;  %s449_s3 = scalar_lea.hbm (!%p104_p10), %s496_s1, %s232_s27  ;;  %s451_s29 = int_to_ptr.vmem [resolvable:$true] %s155_s29 }
  0x12   : > { %s141_s4 = scalar_lea.sflag (!%p104_p10), [#allocation3], %s119_s25  ;;  %s293_s5 = scalar_lea.vmem (!%p104_p10), %s451_s29, 128 }
  0x13   : > { %p294_p12 = scmp.ne.s32.totalorder (!%p104_p10), %s451_s29, %s293_s5 }
  0x14   : > { %v371_v0 = vmov 0   ;;  %s123_s20 = scalar_select %p122_p11, %s361_s9, 1  ;;  %v128_v2 = vlaneseq  ;;  %vm138_vm0 = vcmask 261120   ;;  %v372_v5 = vmov 0.0  }
  0x15   : > { %292 = vset.pattern.permute.xlu0 %v371_v0  ;;  %p295_p13 = pnand %p294_p12, %p424_p4  ;;  %s373_s9 = smov [#allocation2]  }
  0x16   : > { %s229_s21 = sshll.u32 %s123_s20, 3  ;;  %v129_v3 = vand.u32 127, %v128_v2  ;;  %s297_s12 = sshll.u32 %s373_s9, 4  ;;  %s298_s12 = int_to_ptr.vmem [resolvable:$false] %s297_s12 }
  0x17   : > { %s125_s24 = scalar_lea.vmem %s495_s0, %s229_s21  ;;  %p296_p0 = pneg %p295_p13 }
  0x18   : > { %v126_v1 = vld [vmem:[%s125_s24] sm:$0xff]  ;;  %s299_s13 = scalar_lea.vmem %s298_s12, 256  ;;  %p300_p1 = scmp.lt.s32.totalorder %s451_s29, %s298_s12 }
  0x19   : > { %133 = vperm.xlu0 %292, %v126_v1   ;;  %p301_p2 = scmp.lt.s32.totalorder %s299_s13, %s293_s5 }
  0x1b   : > { %p302_p3 = por %p301_p2, %p300_p1 }
  0x1d   : > { %p303_p5 = pnand %p302_p3, %p296_p0 }
  0x94   : > { %v134_v4 = vpop.permute.xlu0 %133 }
  0x95   : > { %vm135_vm1 = vcmp.eq.s32.totalorder %v134_v4, %v129_v3 }
  0x96   : > { %v230_v6 = vsel %vm135_vm1, 1.0, %v372_v5 }
  0x97   : > { %139 = vst.msk [vmem:[%s121_s28] sm:$0xff] %vm138_vm0, %v230_v6 }
  0x98   : > { %306 = shalt.err (!%p303_p5)
}
  0x99   : > { %s307_s15 = scalar_lea.hbm %s449_s3, 128  ;;  %s311_s21 = scalar_lea.hbm %s496_s1, 256 }
  0x9a   : > { %p308_p6 = scmp.ne.s32.totalorder %s449_s3, %s307_s15  ;;  %p312_p10 = scmp.lt.s32.totalorder %s449_s3, %s496_s1 }
  0x9b   : > { %p313_p11 = scmp.lt.s32.totalorder %s311_s21, %s307_s15 }
  0x9c   : > { %p309_p7 = pnand %p308_p6, %p424_p4 }
  0x9d   : > { %p314_p12 = por %p313_p11, %p312_p10 }
  0x9e   : > { %p310_p9 = pneg %p309_p7 }
  0xa0   : > { %p315_p13 = pnand %p314_p12, %p310_p9 }
  0xa2   : > { %318 = shalt.err (!%p315_p13)
}
  0xa3   : > { %235 = dma.vmem_to_hbm [thread:$0]  (%p424_p4), %s451_s29, 128, %s449_s3, %s141_s4  }
  0xa4 PF: > { %p241_p0 = scmp.ge.s32.totalorder %s369_s11, 2  ;;  %s167_s24 = sand.u32 1, %s349_s6  }
  0xa5   : > { %s168_s25 = scalar_lea.sflag [#allocation3], %s167_s24 }
  0xa6   : > { %p238_p1 = pnand %p241_p0, %p431_p8 }
  0xa8   : > { %p239_p2 = pneg %p238_p1 }
  0xaa   : > { %344 = dma.done.wait (%p239_p2), %s168_s25, 128  }
  0xab   : > { %346 = vsyncadd (%p239_p2), %s168_s25, 4294967168  ;;  %s14_s11 = sadd.s32 1, %s369_s11   ;;  %s499_s6 = smov %s353_s7 }
  0xac   : > { %p11_p3 = scmp.ge.s32.totalorder %s14_s11, 4   ;;  %s500_s7 = smov %s357_s8 }
  0xad   : > { %s501_s8 = smov %s437_s19  ;;  %s502_s9 = smov %s365_s10 }
  0xae   : > { %s503_s10 = smov %s505_s14  ;;  %13 = sbr.rel (!%p11_p3) target bundleno = 4 (0x4), region = 59 }
  0xb3   :  { %173 = vsyncpa [#allocation3], 1 }
  0xb4   :  { %175 = vsyncpa [#allocation3 + $0x1], 1 }

</bundles_post_ra>
